<compile_context>
chip_gen: v7x
topology: tpu7x:2x2x1
jax: 0.10.0
libtpu: 0.0.40
codegen_flags: <defaults>
</compile_context>

<pallas_src>
import math

import jax
import jax.numpy as jnp
from jax.experimental import pallas as pl
from jax.experimental.pallas import tpu as pltpu


def _pe_add_kernel(x_ref, pe_ref, o_ref):
    # x_ref: (TILE_B, TILE_C); pe_ref: (1, TILE_C) broadcast over rows.
    o_ref[...] = x_ref[...] + pe_ref[...]
    # TODO(synk): nn.Dropout(p=0.1) is identity at inference; training-mode
    # dropout (pltpu.prng_seed + pltpu.prng_random_bits mask + 1/(1-p) scale)
    # is not fused here.


def make_positional_encoding_table(max_len, d_model, dtype=jnp.float32):
    """Sinusoidal PE table identical to the PyTorch buffer, shape (max_len, d_model)."""
    position = jnp.arange(max_len, dtype=jnp.float32)[:, None]            # (L, 1)
    div_term = jnp.exp(
        jnp.arange(0, d_model, 2, dtype=jnp.float32) * (-math.log(10000.0) / d_model)
    )                                                                      # (D/2,)
    angles = position * div_term                                           # (L, D/2)
    pe = jnp.zeros((max_len, d_model), dtype=jnp.float32)
    pe = pe.at[:, 0::2].set(jnp.sin(angles))
    pe = pe.at[:, 1::2].set(jnp.cos(angles))
    return pe.astype(dtype)


def _choose_tiles(n_rows, n_cols, dtype_bytes, target_block_bytes=2 << 20):
    """Pick (TILE_B, TILE_C).

    TILE_B is a multiple of the packed-sublane count (8/16/32 for 4/2/1-byte
    dtypes) or the full row extent; TILE_C is a multiple of 128 or the full
    column extent; the block is capped around `target_block_bytes` (~2 MiB),
    and we try to expose at least 2 grid blocks for v7x's two TensorCores.
    The grid uses pl.cdiv, so tiles need not divide the array extents.
    """
    sub = max(8, 32 // dtype_bytes)                 # 8 (f32) / 16 (bf16) / 32 (int8/fp8)

    # Row tile.
    if n_rows <= sub:
        tb = n_rows                                  # full extent -> any size allowed
    else:
        tb = max(sub, min(256, (n_rows // sub) * sub))

    # Column (lane) tile.
    if n_cols <= 128:
        tc = n_cols                                  # full extent -> any size allowed
    else:
        budget = max(128, (target_block_bytes // (tb * dtype_bytes)) // 128 * 128)
        tc = max(128, min((n_cols // 128) * 128, budget))

    # Guarantee >= 2 blocks along a parallel axis when layout rules allow it
    # (otherwise one v7x TensorCore sits idle).
    if pl.cdiv(n_rows, tb) * pl.cdiv(n_cols, tc) < 2:
        if n_rows > sub and tb >= 2 * sub:
            tb = max(sub, (pl.cdiv(tb, 2) // sub) * sub)
        elif n_cols > 128 and tc >= 256:
            tc = max(128, (pl.cdiv(tc, 2) // 128) * 128)
    return tb, tc


def positional_encoding_forward(x, pe_table):
    """x: (B, S, D); pe_table: (max_len, D) with max_len >= S. Returns x + pe[:S]."""
    B, S, D = x.shape
    max_len, d_model = pe_table.shape
    if d_model != D:
        raise ValueError(f"pe_table d_model={d_model} does not match x d_model={D}")
    if S > max_len:
        raise ValueError(f"sequence length {S} exceeds pe_table max_len {max_len}")

    pe = pe_table[:S, :].astype(x.dtype)

    # Lane-dense flattening: the written last dim is S*D (>=128 / multiple of
    # 128 whenever possible) instead of D which may be < 128 (D = 32 here),
    # avoiding masked vst.msk partial stores.
    N = S * D
    x2d = x.reshape(B, N)
    pe2d = pe.reshape(1, N)

    tb, tc = _choose_tiles(B, N, x.dtype.itemsize)

    # Column tiles on the OUTER grid axis, row tiles inner: the PE block index
    # (0, j) is constant across the inner row loop, so Pallas keeps the PE tile
    # resident instead of re-fetching it from HBM once per row tile.
    grid = (pl.cdiv(N, tc), pl.cdiv(B, tb))

    out2d = pl.pallas_call(
        _pe_add_kernel,
        out_shape=jax.ShapeDtypeStruct((B, N), x.dtype),
        grid=grid,
        in_specs=[
            pl.BlockSpec((tb, tc), lambda j, i: (i, j)),
            pl.BlockSpec((1, tc), lambda j, i: (0, j)),
        ],
        out_specs=pl.BlockSpec((tb, tc), lambda j, i: (i, j)),
        input_output_aliases={0: 0},   # add in place over x2d (x may be donated)
        compiler_params=pltpu.CompilerParams(
            dimension_semantics=("parallel", "parallel"),
        ),
    )(x2d, pe2d)
    return out2d.reshape(B, S, D)


if __name__ == "__main__":
    # Small shapes consistent with the module's forward: (batch, seq, d_model)
    B, S, D = 2, 8, 32
    MAX_LEN = 100

    key = jax.random.PRNGKey(0)
    x = jax.random.normal(key, (B, S, D), dtype=jnp.float32)

    pe_table = make_positional_encoding_table(MAX_LEN, D, dtype=jnp.float32)

    # Reference computed before the kernel call (input 0 is aliased/donated).
    ref = x + pe_table[None, :S, :].astype(x.dtype)

    fwd = jax.jit(positional_encoding_forward)
    out = jax.block_until_ready(fwd(x, pe_table))

    assert out.shape == (B, S, D)
    assert jnp.allclose(out, ref, atol=1e-6, rtol=1e-6), "mismatch vs reference"

    print("KERNEL_OK")
</pallas_src>

<mosaic_0001>
module attributes {stable_mosaic.version = 11 : i64} {
  func.func @_pe_add_kernel(%arg0: i32, %arg1: i32, %arg2: memref<2x128xf32, #tpu.memory_space<vmem>>, %arg3: memref<1x128xf32, #tpu.memory_space<vmem>>, %arg4: memref<2x128xf32, #tpu.memory_space<vmem>>) attributes {dimension_semantics = [#tpu.dimension_semantics<parallel>, #tpu.dimension_semantics<parallel>], iteration_bounds = array<i64: 2, 1>, scalar_prefetch = 0 : i64, scratch_operands = 0 : i64, tpu.core_type = #tpu.core_type<tc>, window_params = [{transform_indices = @transform_0, window_bounds = array<i64: 2, 128>}, {transform_indices = @transform_1, window_bounds = array<i64: 1, 128>}, {transform_indices = @transform_2, window_bounds = array<i64: 2, 128>}]} {
    %c0 = arith.constant 0 : index
    %c0_0 = arith.constant 0 : index
    %0 = vector.load %arg2[%c0, %c0_0] : memref<2x128xf32, #tpu.memory_space<vmem>>, vector<2x128xf32>
    %c0_1 = arith.constant 0 : index
    %c0_2 = arith.constant 0 : index
    %1 = vector.load %arg3[%c0_1, %c0_2] : memref<1x128xf32, #tpu.memory_space<vmem>>, vector<1x128xf32>
    %2 = vector.broadcast %1 : vector<1x128xf32> to vector<2x128xf32>
    %3 = arith.addf %0, %2 : vector<2x128xf32>
    %c0_3 = arith.constant 0 : index
    %c0_4 = arith.constant 0 : index
    %4 = vector.load %arg4[%c0_3, %c0_4] : memref<2x128xf32, #tpu.memory_space<vmem>>, vector<2x128xf32>
    tpu.vector_store %arg4[%c0_3, %c0_4], %3 {strides = array<i32>} : memref<2x128xf32, #tpu.memory_space<vmem>>, vector<2x128xf32>,
    return
  }
  func.func @transform_0(%arg0: i32, %arg1: i32) -> (i32, i32) {
    %c0_i32 = arith.constant 0 : i32
    return %arg1, %arg0 : i32, i32
  }
  func.func @transform_1(%arg0: i32, %arg1: i32) -> (i32, i32) {
    %c0_i32 = arith.constant 0 : i32
    %c0_i32_0 = arith.constant 0 : i32
    return %c0_i32, %arg0 : i32, i32
  }
  func.func @transform_2(%arg0: i32, %arg1: i32) -> (i32, i32) {
    %c0_i32 = arith.constant 0 : i32
    return %arg1, %arg0 : i32, i32
  }
}

</mosaic_0001>

<bundles_post_ra>
// kernel: positional_encoding_forward.1
= control target key start
LH: loop header
LB: loop body
LE: loop exit
PB: predicated region body
PF: predicated region fallthrough
CT: control target
= control target key end

     0   :  { %s364_s9 = smov 0   ;;  %s366_s10 = smov 0   ;;  %s383_s0 = inlined_call_operand.vmem [shape: f32[2,256], index: 0, kind: input, shape index: {}, may-alias: {0,2}]   ;;  %s384_s1 = inlined_call_operand.vmem [shape: f32[1,256], index: 1, kind: input, shape index: {}]   ;;  %s385_s2 = inlined_call_operand.vmem [shape: f32[2,256], index: 2, kind: output, shape index: {}, may-alias: {0,2}]  }
   0x1   :  { %s345_s11 = smov 0  }
   0x2 LB: > { %s24_s12 = sadd.s32 1, %s343_s10  ;;  %p295_p0 = scmp.ge.s32.totalorder %s347_s11, 1  ;;  %s347_s11 = sphi %s345_s11, %s12_s11   ;;  %s343_s10 = sphi %s366_s10, %s387_s10   ;;  %s339_s9 = sphi %s364_s9, %s386_s9  }
   0x3   : > { %p26_p1 = scmp.ge.s32.totalorder %s24_s12, 2  ;;  %p139_p2 = scmp.lt.s32.totalorder %s347_s11, 3 }
   0x5   : > { %s389_s12 = smov (%p26_p1, %s24_s12), 0  ;;  %p140_p3 = pnand %p295_p0, %p139_p2 }
   0x6   : > { %p172_p4 = scmp.lt.s32.totalorder (!%p140_p3), %s339_s9, 1 }
   0x7   : > { %143 = sbr.rel (%p140_p3) target bundleno = 21 (0x15), region = 28 }
   0xe   : > { %s391_s9 = smov (!%p172_p4, %s339_s9), 1 }
   0xf   : > { %s296_s13 = sshll.u32 %s391_s9, 1  ;;  %s180_s16 = scalar_lea.vmem %s384_s1, %s391_s9 }
  0x10   : > { %s177_s19 = scalar_lea.vmem %s383_s0, %s296_s13  ;;  %v298_v0 = vld [vmem:[%s180_s16] ss:$0 sm:$0xff]  ;;  %s188_s22 = scalar_lea.vmem %s385_s2, %s296_s13 }
  0x11   : > { %v189_v1 = vld [vmem:[%s177_s19] sm:$0x3] }
  0x12   : > { %v197_v2 = vadd.f32 %v298_v0, %v189_v1 }
  0x14   : > { %198 = vst [vmem:[%s188_s22] sm:$0x3] %v197_v2 }
  0x15 PF: > { %s12_s11 = sadd.s32 1, %s347_s11   ;;  %s386_s9 = smov %s343_s10 }
  0x16   : > { %p9_p5 = scmp.ge.s32.totalorder %s12_s11, 4   ;;  %s387_s10 = smov %s389_s12 }
  0x18   :  { %11 = sbr.rel (!%p9_p5) target bundleno = 2 (0x2), region = 61 }

</bundles_post_ra>
